<compile_context>
chip_gen: v7x
topology: tpu7x:2x2x1
jax: 0.10.0
libtpu: 0.0.40
codegen_flags: <defaults>
</compile_context>

<pallas_src>
import jax
import jax.numpy as jnp
from jax import lax
from jax.experimental import pallas as pl
from jax.experimental.pallas import tpu as pltpu


def _round_up(x, m):
    return (x + m - 1) // m * m


def gru_chunk_kernel(gi_ref, whh_ref, bhh_ref, h_ref):
    """One (batch-tile, time-chunk) grid step of the GRU recurrence.

    gi_ref : (Tc, 3, Bc, H)  precomputed x_t @ W_ih + b_ih, gate-major (r, z, n)
    whh_ref: (3, H, H)       per-gate recurrent weights; gh_g = h @ whh[g]
    bhh_ref: (3, 1, H)       per-gate recurrent biases
    h_ref  : (Bc, H)         output block, doubles as the resident hidden state
    """
    tc = pl.program_id(1)

    @pl.when(tc == 0)
    def _init():
        h_ref[...] = jnp.zeros_like(h_ref)

    # Hoist loop-invariant loads out of the timestep loop.
    whh = whh_ref[...]                       # (3, H, H)
    bhh = bhh_ref[...]                       # (3, 1, H)
    w_r, w_z, w_n = whh[0], whh[1], whh[2]
    b_r, b_z, b_n = bhh[0], bhh[1], bhh[2]

    n_steps = gi_ref.shape[0]                # Tc (static)

    def step(i, h):
        gi_t = gi_ref[i]                     # (3, Bc, H) — dynamic leading-axis index
        gi_r, gi_z, gi_n = gi_t[0], gi_t[1], gi_t[2]
        gh_r = jnp.dot(h, w_r, preferred_element_type=jnp.float32) + b_r
        gh_z = jnp.dot(h, w_z, preferred_element_type=jnp.float32) + b_z
        gh_n = jnp.dot(h, w_n, preferred_element_type=jnp.float32) + b_n
        r = jax.nn.sigmoid(gi_r + gh_r)
        z = jax.nn.sigmoid(gi_z + gh_z)
        n = jnp.tanh(gi_n + r * gh_n)        # PyTorch: b_hn inside the r-product
        return (1.0 - z) * n + z * h

    h_ref[...] = lax.fori_loop(0, n_steps, step, h_ref[...], unroll=True)


def rnn_classifier_forward(tokens, params, *, time_chunk=32, batch_tile=8):
    """tokens: (B, T) int32 -> logits (B,) float32."""
    emb = params["embedding"]                # (V, E)
    w_ih = params["w_ih"]                    # (E, 3H)   (transposed PyTorch weight_ih_l0)
    w_hh = params["w_hh"]                    # (H, 3H)   (transposed PyTorch weight_hh_l0)
    b_ih = params["b_ih"]                    # (1, 3H)
    b_hh = params["b_hh"]                    # (1, 3H)
    w_c = params["w_c"]                      # (H, 1)
    b_c = params["b_c"]                      # (1, 1)

    B, T = tokens.shape
    E = emb.shape[1]
    H = w_hh.shape[0]

    # ---- batch padding: fill the 8-row sublane tile (padded rows discarded) ----
    Bc = batch_tile
    B_pad = _round_up(B, Bc)
    if B_pad != B:
        tokens = jnp.pad(tokens, ((0, B_pad - B), (0, 0)))   # token 0 is valid

    # ---- time chunking (keep the chunk small enough for VMEM, incl. v7x 64 MiB) ----
    Tc = min(time_chunk, T)
    T_pad = _round_up(T, Tc)
    nt = T_pad // Tc
    nb = B_pad // Bc

    # ---- input projection hoisted out of the recurrence: one big MXU matmul ----
    # Embedding gather kept as JAX glue (no clean BlockSpec form for a gather).
    x_emb = jnp.take(emb, tokens, axis=0).astype(jnp.float32)        # (B_pad, T, E)
    gi = x_emb.reshape(B_pad * T, E) @ w_ih + b_ih                   # (B_pad*T, 3H)
    gi = gi.reshape(B_pad, T, 3, H)                                  # gate-major split
    gi = jnp.transpose(gi, (1, 2, 0, 3))                             # (T, 3, B_pad, H)

    if T_pad != T:
        # Identity padding of extra timesteps: z-gate preact -> huge  =>  z == 1.0
        # exactly in f32, so h_new = z*h = h (exact no-op step).
        pad = jnp.zeros((T_pad - T, 3, B_pad, H), jnp.float32)
        pad = pad.at[:, 1].set(1e9)
        gi = jnp.concatenate([gi, pad], axis=0)

    # Per-gate recurrent weights/biases, lane-aligned layout:
    #   whh_g[g] = w_hh[:, g*H:(g+1)*H]  -> (3, H, H);   bhh_g[g] -> (1, H)
    whh_g = jnp.transpose(w_hh.reshape(H, 3, H), (1, 0, 2))
    bhh_g = b_hh.reshape(3, 1, H)

    h_last = pl.pallas_call(
        gru_chunk_kernel,
        out_shape=jax.ShapeDtypeStruct((B_pad, H), jnp.float32),
        grid_spec=pltpu.PrefetchScalarGridSpec(
            num_scalar_prefetch=0,
            grid=(nb, nt),                                           # (batch, time-chunks)
            in_specs=[
                pl.BlockSpec((Tc, 3, Bc, H), lambda b, t: (t, 0, b, 0)),  # gi chunk
                pl.BlockSpec((3, H, H), lambda b, t: (0, 0, 0)),          # W_hh (resident)
                pl.BlockSpec((3, 1, H), lambda b, t: (0, 0, 0)),          # b_hh (resident)
            ],
            out_specs=pl.BlockSpec((Bc, H), lambda b, t: (b, 0)),         # final hidden
        ),
        compiler_params=pltpu.CompilerParams(
            # batch tiles independent -> parallel (v7x 2 TCs); recurrence -> arbitrary
            dimension_semantics=("parallel", "arbitrary"),
        ),
    )(gi, whh_g, bhh_g)

    # Tiny classifier head stays in JAX: an N=1 matmul with a 1-lane output block
    # would waste an MXU pass and force masked partial stores inside the kernel.
    logits = h_last[:B] @ w_c + b_c                                   # (B, 1)
    return logits[:, 0]                                               # .squeeze(-1)


def init_params(key, vocab_size, emb_dim, hidden_dim):
    """Deterministic parameter init mirroring PyTorch default init shapes/scales."""
    k_emb, k_wih, k_whh, k_bih, k_bhh, k_wc, k_bc = jax.random.split(key, 7)
    k = 1.0 / jnp.sqrt(hidden_dim)
    return {
        "embedding": jax.random.normal(k_emb, (vocab_size, emb_dim), jnp.float32),
        "w_ih": jax.random.uniform(k_wih, (emb_dim, 3 * hidden_dim), jnp.float32, -k, k),
        "w_hh": jax.random.uniform(k_whh, (hidden_dim, 3 * hidden_dim), jnp.float32, -k, k),
        "b_ih": jax.random.uniform(k_bih, (1, 3 * hidden_dim), jnp.float32, -k, k),
        "b_hh": jax.random.uniform(k_bhh, (1, 3 * hidden_dim), jnp.float32, -k, k),
        "w_c": jax.random.uniform(k_wc, (hidden_dim, 1), jnp.float32, -k, k),
        "b_c": jax.random.uniform(k_bc, (1, 1), jnp.float32, -k, k),
    }


def reference_forward(tokens, params):
    """Pure-JAX reference matching torch.nn.GRU + Linear semantics."""
    x = jnp.take(params["embedding"], tokens, axis=0).astype(jnp.float32)  # (B, T, E)
    B, T, _ = x.shape
    H = params["w_hh"].shape[0]
    h = jnp.zeros((B, H), jnp.float32)
    b_ih, b_hh = params["b_ih"][0], params["b_hh"][0]
    for t in range(T):
        xt = x[:, t]
        gi = xt @ params["w_ih"] + b_ih
        gh = h @ params["w_hh"] + b_hh
        r = jax.nn.sigmoid(gi[:, :H] + gh[:, :H])
        z = jax.nn.sigmoid(gi[:, H:2 * H] + gh[:, H:2 * H])
        n = jnp.tanh(gi[:, 2 * H:] + r * gh[:, 2 * H:])
        h = (1.0 - z) * n + z * h
    return (h @ params["w_c"] + params["b_c"])[:, 0]


if __name__ == "__main__":
    B, T = 2, 8
    VOCAB, EMB, HID = 50, 32, 32

    key = jax.random.PRNGKey(0)
    k_tok, k_par = jax.random.split(key)
    tokens = jax.random.randint(k_tok, (B, T), 0, VOCAB, dtype=jnp.int32)
    params = init_params(k_par, VOCAB, EMB, HID)

    # time_chunk=4 -> 2 time chunks, exercising the resident-hidden accumulator
    # pattern across the "arbitrary" grid axis even at this tiny seq length.
    logits = rnn_classifier_forward(tokens, params, time_chunk=4)
    logits = jax.block_until_ready(logits)

    ref = reference_forward(tokens, params)
    assert logits.shape == (B,)
    assert jnp.allclose(logits, ref, atol=1e-5, rtol=1e-5), (logits, ref)

    print("KERNEL_OK")
</pallas_src>

<mosaic_0001>
module attributes {stable_mosaic.version = 11 : i64} {
  func.func @gru_chunk_kernel(%arg0: i32, %arg1: i32, %arg2: memref<4x3x8x32xf32, #tpu.memory_space<vmem>>, %arg3: memref<3x32x32xf32, #tpu.memory_space<vmem>>, %arg4: memref<3x1x32xf32, #tpu.memory_space<vmem>>, %arg5: memref<8x32xf32, #tpu.memory_space<vmem>>) attributes {dimension_semantics = [#tpu.dimension_semantics<parallel>, #tpu.dimension_semantics<arbitrary>], iteration_bounds = array<i64: 1, 2>, scalar_prefetch = 0 : i64, scratch_operands = 0 : i64, tpu.core_type = #tpu.core_type<tc>, window_params = [{transform_indices = @transform_0, window_bounds = array<i64: 4, 3, 8, 32>}, {pipeline_mode = #tpu.pipeline_mode<synchronous>, transform_indices = @transform_1, window_bounds = array<i64: 3, 32, 32>}, {pipeline_mode = #tpu.pipeline_mode<synchronous>, transform_indices = @transform_2, window_bounds = array<i64: 3, 1, 32>}, {transform_indices = @transform_3, window_bounds = array<i64: 8, 32>}]} {
    %c0_i32 = arith.constant 0 : i32
    %0 = arith.cmpi eq, %arg1, %c0_i32 : i32
    %1 = arith.extui %0 : i1 to i32
    %c0_i32_0 = arith.constant 0 : i32
    %2 = arith.cmpi ne, %1, %c0_i32_0 : i32
    scf.if %2 {
      %cst_46 = arith.constant 0.000000e+00 : f32
      %171 = vector.broadcast %cst_46 : f32 to vector<8x32xf32>
      %c0_47 = arith.constant 0 : index
      %c0_48 = arith.constant 0 : index
      %172 = vector.load %arg5[%c0_47, %c0_48] : memref<8x32xf32, #tpu.memory_space<vmem>>, vector<8x32xf32>
      tpu.vector_store %arg5[%c0_47, %c0_48], %171 {strides = array<i32>} : memref<8x32xf32, #tpu.memory_space<vmem>>, vector<8x32xf32>,
    } else {
    }
    %c0 = arith.constant 0 : index
    %c0_1 = arith.constant 0 : index
    %c0_2 = arith.constant 0 : index
    %3 = vector.load %arg3[%c0, %c0_1, %c0_2] : memref<3x32x32xf32, #tpu.memory_space<vmem>>, vector<3x32x32xf32>
    %c0_3 = arith.constant 0 : index
    %c0_4 = arith.constant 0 : index
    %c0_5 = arith.constant 0 : index
    %4 = vector.load %arg4[%c0_3, %c0_4, %c0_5] : memref<3x1x32xf32, #tpu.memory_space<vmem>>, vector<3x1x32xf32>
    %5 = vector.extract_strided_slice %3 {offsets = [0, 0, 0], sizes = [1, 32, 32], strides = [1, 1, 1]} : vector<3x32x32xf32> to vector<1x32x32xf32>
    %6 = vector.shape_cast %5 : vector<1x32x32xf32> to vector<32x32xf32>
    %7 = vector.extract_strided_slice %3 {offsets = [1, 0, 0], sizes = [1, 32, 32], strides = [1, 1, 1]} : vector<3x32x32xf32> to vector<1x32x32xf32>
    %8 = vector.shape_cast %7 : vector<1x32x32xf32> to vector<32x32xf32>
    %9 = vector.extract_strided_slice %3 {offsets = [2, 0, 0], sizes = [1, 32, 32], strides = [1, 1, 1]} : vector<3x32x32xf32> to vector<1x32x32xf32>
    %10 = vector.shape_cast %9 : vector<1x32x32xf32> to vector<32x32xf32>
    %11 = vector.extract_strided_slice %4 {offsets = [0, 0, 0], sizes = [1, 1, 32], strides = [1, 1, 1]} : vector<3x1x32xf32> to vector<1x1x32xf32>
    %12 = vector.shape_cast %11 : vector<1x1x32xf32> to vector<1x32xf32>
    %13 = vector.extract_strided_slice %4 {offsets = [1, 0, 0], sizes = [1, 1, 32], strides = [1, 1, 1]} : vector<3x1x32xf32> to vector<1x1x32xf32>
    %14 = vector.shape_cast %13 : vector<1x1x32xf32> to vector<1x32xf32>
    %15 = vector.extract_strided_slice %4 {offsets = [2, 0, 0], sizes = [1, 1, 32], strides = [1, 1, 1]} : vector<3x1x32xf32> to vector<1x1x32xf32>
    %16 = vector.shape_cast %15 : vector<1x1x32xf32> to vector<1x32xf32>
    %c0_6 = arith.constant 0 : index
    %c0_7 = arith.constant 0 : index
    %17 = vector.load %arg5[%c0_6, %c0_7] : memref<8x32xf32, #tpu.memory_space<vmem>>, vector<8x32xf32>
    %c0_i32_8 = arith.constant 0 : i32
    %18 = arith.index_cast %c0_i32_8 : i32 to index
    %c0_9 = arith.constant 0 : index
    %c0_10 = arith.constant 0 : index
    %c0_11 = arith.constant 0 : index
    %19 = vector.load %arg2[%18, %c0_9, %c0_10, %c0_11] : memref<4x3x8x32xf32, #tpu.memory_space<vmem>>, vector<1x3x8x32xf32>
    %20 = vector.shape_cast %19 : vector<1x3x8x32xf32> to vector<3x8x32xf32>
    %21 = vector.extract_strided_slice %20 {offsets = [0, 0, 0], sizes = [1, 8, 32], strides = [1, 1, 1]} : vector<3x8x32xf32> to vector<1x8x32xf32>
    %22 = vector.shape_cast %21 : vector<1x8x32xf32> to vector<8x32xf32>
    %23 = vector.extract_strided_slice %20 {offsets = [1, 0, 0], sizes = [1, 8, 32], strides = [1, 1, 1]} : vector<3x8x32xf32> to vector<1x8x32xf32>
    %24 = vector.shape_cast %23 : vector<1x8x32xf32> to vector<8x32xf32>
    %25 = vector.extract_strided_slice %20 {offsets = [2, 0, 0], sizes = [1, 8, 32], strides = [1, 1, 1]} : vector<3x8x32xf32> to vector<1x8x32xf32>
    %26 = vector.shape_cast %25 : vector<1x8x32xf32> to vector<8x32xf32>
    %cst = arith.constant dense<0.000000e+00> : vector<8x32xf32>
    %27 = tpu.matmul %17, %6, %cst {dimension_numbers = #tpu.dot_dimension_numbers<[1], [0], [0], [1], [0, 0, 1, 1], [], []>} : vector<8x32xf32>, vector<32x32xf32>, vector<8x32xf32> -> vector<8x32xf32>
    %28 = vector.broadcast %12 : vector<1x32xf32> to vector<8x32xf32>
    %29 = arith.addf %27, %28 : vector<8x32xf32>
    %cst_12 = arith.constant dense<0.000000e+00> : vector<8x32xf32>
    %30 = tpu.matmul %17, %8, %cst_12 {dimension_numbers = #tpu.dot_dimension_numbers<[1], [0], [0], [1], [0, 0, 1, 1], [], []>} : vector<8x32xf32>, vector<32x32xf32>, vector<8x32xf32> -> vector<8x32xf32>
    %31 = vector.broadcast %14 : vector<1x32xf32> to vector<8x32xf32>
    %32 = arith.addf %30, %31 : vector<8x32xf32>
    %cst_13 = arith.constant dense<0.000000e+00> : vector<8x32xf32>
    %33 = tpu.matmul %17, %10, %cst_13 {dimension_numbers = #tpu.dot_dimension_numbers<[1], [0], [0], [1], [0, 0, 1, 1], [], []>} : vector<8x32xf32>, vector<32x32xf32>, vector<8x32xf32> -> vector<8x32xf32>
    %34 = vector.broadcast %16 : vector<1x32xf32> to vector<8x32xf32>
    %35 = arith.addf %33, %34 : vector<8x32xf32>
    %36 = arith.addf %22, %29 : vector<8x32xf32>
    %37 = arith.negf %36 : vector<8x32xf32>
    %38 = math.exp %37 : vector<8x32xf32>
    %cst_14 = arith.constant 1.000000e+00 : f32
    %39 = vector.broadcast %cst_14 : f32 to vector<8x32xf32>
    %40 = arith.addf %39, %38 : vector<8x32xf32>
    %41 = arith.divf %39, %40 : vector<8x32xf32>
    %42 = arith.addf %24, %32 : vector<8x32xf32>
    %43 = arith.negf %42 : vector<8x32xf32>
    %44 = math.exp %43 : vector<8x32xf32>
    %cst_15 = arith.constant 1.000000e+00 : f32
    %45 = vector.broadcast %cst_15 : f32 to vector<8x32xf32>
    %46 = arith.addf %45, %44 : vector<8x32xf32>
    %47 = arith.divf %45, %46 : vector<8x32xf32>
    %48 = arith.mulf %41, %35 : vector<8x32xf32>
    %49 = arith.addf %26, %48 : vector<8x32xf32>
    %50 = math.tanh %49 : vector<8x32xf32>
    %cst_16 = arith.constant 1.000000e+00 : f32
    %51 = vector.broadcast %cst_16 : f32 to vector<8x32xf32>
    %52 = arith.subf %51, %47 : vector<8x32xf32>
    %53 = arith.mulf %52, %50 : vector<8x32xf32>
    %54 = arith.mulf %47, %17 : vector<8x32xf32>
    %55 = arith.addf %53, %54 : vector<8x32xf32>
    %c1_i32 = arith.constant 1 : i32
    %56 = arith.index_cast %c1_i32 : i32 to index
    %c0_17 = arith.constant 0 : index
    %c0_18 = arith.constant 0 : index
    %c0_19 = arith.constant 0 : index
    %57 = vector.load %arg2[%56, %c0_17, %c0_18, %c0_19] : memref<4x3x8x32xf32, #tpu.memory_space<vmem>>, vector<1x3x8x32xf32>
    %58 = vector.shape_cast %57 : vector<1x3x8x32xf32> to vector<3x8x32xf32>
    %59 = vector.extract_strided_slice %58 {offsets = [0, 0, 0], sizes = [1, 8, 32], strides = [1, 1, 1]} : vector<3x8x32xf32> to vector<1x8x32xf32>
    %60 = vector.shape_cast %59 : vector<1x8x32xf32> to vector<8x32xf32>
    %61 = vector.extract_strided_slice %58 {offsets = [1, 0, 0], sizes = [1, 8, 32], strides = [1, 1, 1]} : vector<3x8x32xf32> to vector<1x8x32xf32>
    %62 = vector.shape_cast %61 : vector<1x8x32xf32> to vector<8x32xf32>
    %63 = vector.extract_strided_slice %58 {offsets = [2, 0, 0], sizes = [1, 8, 32], strides = [1, 1, 1]} : vector<3x8x32xf32> to vector<1x8x32xf32>
    %64 = vector.shape_cast %63 : vector<1x8x32xf32> to vector<8x32xf32>
    %cst_20 = arith.constant dense<0.000000e+00> : vector<8x32xf32>
    %65 = tpu.matmul %55, %6, %cst_20 {dimension_numbers = #tpu.dot_dimension_numbers<[1], [0], [0], [1], [0, 0, 1, 1], [], []>} : vector<8x32xf32>, vector<32x32xf32>, vector<8x32xf32> -> vector<8x32xf32>
    %66 = vector.broadcast %12 : vector<1x32xf32> to vector<8x32xf32>
    %67 = arith.addf %65, %66 : vector<8x32xf32>
    %cst_21 = arith.constant dense<0.000000e+00> : vector<8x32xf32>
    %68 = tpu.matmul %55, %8, %cst_21 {dimension_numbers = #tpu.dot_dimension_numbers<[1], [0], [0], [1], [0, 0, 1, 1], [], []>} : vector<8x32xf32>, vector<32x32xf32>, vector<8x32xf32> -> vector<8x32xf32>
    %69 = vector.broadcast %14 : vector<1x32xf32> to vector<8x32xf32>
    %70 = arith.addf %68, %69 : vector<8x32xf32>
    %cst_22 = arith.constant dense<0.000000e+00> : vector<8x32xf32>
    %71 = tpu.matmul %55, %10, %cst_22 {dimension_numbers = #tpu.dot_dimension_numbers<[1], [0], [0], [1], [0, 0, 1, 1], [], []>} : vector<8x32xf32>, vector<32x32xf32>, vector<8x32xf32> -> vector<8x32xf32>
    %72 = vector.broadcast %16 : vector<1x32xf32> to vector<8x32xf32>
    %73 = arith.addf %71, %72 : vector<8x32xf32>
    %74 = arith.addf %60, %67 : vector<8x32xf32>
    %75 = arith.negf %74 : vector<8x32xf32>
    %76 = math.exp %75 : vector<8x32xf32>
    %cst_23 = arith.constant 1.000000e+00 : f32
    %77 = vector.broadcast %cst_23 : f32 to vector<8x32xf32>
    %78 = arith.addf %77, %76 : vector<8x32xf32>
    %79 = arith.divf %77, %78 : vector<8x32xf32>
    %80 = arith.addf %62, %70 : vector<8x32xf32>
    %81 = arith.negf %80 : vector<8x32xf32>
    %82 = math.exp %81 : vector<8x32xf32>
    %cst_24 = arith.constant 1.000000e+00 : f32
    %83 = vector.broadcast %cst_24 : f32 to vector<8x32xf32>
    %84 = arith.addf %83, %82 : vector<8x32xf32>
    %85 = arith.divf %83, %84 : vector<8x32xf32>
    %86 = arith.mulf %79, %73 : vector<8x32xf32>
    %87 = arith.addf %64, %86 : vector<8x32xf32>
    %88 = math.tanh %87 : vector<8x32xf32>
    %cst_25 = arith.constant 1.000000e+00 : f32
    %89 = vector.broadcast %cst_25 : f32 to vector<8x32xf32>
    %90 = arith.subf %89, %85 : vector<8x32xf32>
    %91 = arith.mulf %90, %88 : vector<8x32xf32>
    %92 = arith.mulf %85, %55 : vector<8x32xf32>
    %93 = arith.addf %91, %92 : vector<8x32xf32>
    %c2_i32 = arith.constant 2 : i32
    %94 = arith.index_cast %c2_i32 : i32 to index
    %c0_26 = arith.constant 0 : index
    %c0_27 = arith.constant 0 : index
    %c0_28 = arith.constant 0 : index
    %95 = vector.load %arg2[%94, %c0_26, %c0_27, %c0_28] : memref<4x3x8x32xf32, #tpu.memory_space<vmem>>, vector<1x3x8x32xf32>
    %96 = vector.shape_cast %95 : vector<1x3x8x32xf32> to vector<3x8x32xf32>
    %97 = vector.extract_strided_slice %96 {offsets = [0, 0, 0], sizes = [1, 8, 32], strides = [1, 1, 1]} : vector<3x8x32xf32> to vector<1x8x32xf32>
    %98 = vector.shape_cast %97 : vector<1x8x32xf32> to vector<8x32xf32>
    %99 = vector.extract_strided_slice %96 {offsets = [1, 0, 0], sizes = [1, 8, 32], strides = [1, 1, 1]} : vector<3x8x32xf32> to vector<1x8x32xf32>
    %100 = vector.shape_cast %99 : vector<1x8x32xf32> to vector<8x32xf32>
    %101 = vector.extract_strided_slice %96 {offsets = [2, 0, 0], sizes = [1, 8, 32], strides = [1, 1, 1]} : vector<3x8x32xf32> to vector<1x8x32xf32>
    %102 = vector.shape_cast %101 : vector<1x8x32xf32> to vector<8x32xf32>
    %cst_29 = arith.constant dense<0.000000e+00> : vector<8x32xf32>
    %103 = tpu.matmul %93, %6, %cst_29 {dimension_numbers = #tpu.dot_dimension_numbers<[1], [0], [0], [1], [0, 0, 1, 1], [], []>} : vector<8x32xf32>, vector<32x32xf32>, vector<8x32xf32> -> vector<8x32xf32>
    %104 = vector.broadcast %12 : vector<1x32xf32> to vector<8x32xf32>
    %105 = arith.addf %103, %104 : vector<8x32xf32>
    %cst_30 = arith.constant dense<0.000000e+00> : vector<8x32xf32>
    %106 = tpu.matmul %93, %8, %cst_30 {dimension_numbers = #tpu.dot_dimension_numbers<[1], [0], [0], [1], [0, 0, 1, 1], [], []>} : vector<8x32xf32>, vector<32x32xf32>, vector<8x32xf32> -> vector<8x32xf32>
    %107 = vector.broadcast %14 : vector<1x32xf32> to vector<8x32xf32>
    %108 = arith.addf %106, %107 : vector<8x32xf32>
    %cst_31 = arith.constant dense<0.000000e+00> : vector<8x32xf32>
    %109 = tpu.matmul %93, %10, %cst_31 {dimension_numbers = #tpu.dot_dimension_numbers<[1], [0], [0], [1], [0, 0, 1, 1], [], []>} : vector<8x32xf32>, vector<32x32xf32>, vector<8x32xf32> -> vector<8x32xf32>
    %110 = vector.broadcast %16 : vector<1x32xf32> to vector<8x32xf32>
    %111 = arith.addf %109, %110 : vector<8x32xf32>
    %112 = arith.addf %98, %105 : vector<8x32xf32>
    %113 = arith.negf %112 : vector<8x32xf32>
    %114 = math.exp %113 : vector<8x32xf32>
    %cst_32 = arith.constant 1.000000e+00 : f32
    %115 = vector.broadcast %cst_32 : f32 to vector<8x32xf32>
    %116 = arith.addf %115, %114 : vector<8x32xf32>
    %117 = arith.divf %115, %116 : vector<8x32xf32>
    %118 = arith.addf %100, %108 : vector<8x32xf32>
    %119 = arith.negf %118 : vector<8x32xf32>
    %120 = math.exp %119 : vector<8x32xf32>
    %cst_33 = arith.constant 1.000000e+00 : f32
    %121 = vector.broadcast %cst_33 : f32 to vector<8x32xf32>
    %122 = arith.addf %121, %120 : vector<8x32xf32>
    %123 = arith.divf %121, %122 : vector<8x32xf32>
    %124 = arith.mulf %117, %111 : vector<8x32xf32>
    %125 = arith.addf %102, %124 : vector<8x32xf32>
    %126 = math.tanh %125 : vector<8x32xf32>
    %cst_34 = arith.constant 1.000000e+00 : f32
    %127 = vector.broadcast %cst_34 : f32 to vector<8x32xf32>
    %128 = arith.subf %127, %123 : vector<8x32xf32>
    %129 = arith.mulf %128, %126 : vector<8x32xf32>
    %130 = arith.mulf %123, %93 : vector<8x32xf32>
    %131 = arith.addf %129, %130 : vector<8x32xf32>
    %c3_i32 = arith.constant 3 : i32
    %132 = arith.index_cast %c3_i32 : i32 to index
    %c0_35 = arith.constant 0 : index
    %c0_36 = arith.constant 0 : index
    %c0_37 = arith.constant 0 : index
    %133 = vector.load %arg2[%132, %c0_35, %c0_36, %c0_37] : memref<4x3x8x32xf32, #tpu.memory_space<vmem>>, vector<1x3x8x32xf32>
    %134 = vector.shape_cast %133 : vector<1x3x8x32xf32> to vector<3x8x32xf32>
    %135 = vector.extract_strided_slice %134 {offsets = [0, 0, 0], sizes = [1, 8, 32], strides = [1, 1, 1]} : vector<3x8x32xf32> to vector<1x8x32xf32>
    %136 = vector.shape_cast %135 : vector<1x8x32xf32> to vector<8x32xf32>
    %137 = vector.extract_strided_slice %134 {offsets = [1, 0, 0], sizes = [1, 8, 32], strides = [1, 1, 1]} : vector<3x8x32xf32> to vector<1x8x32xf32>
    %138 = vector.shape_cast %137 : vector<1x8x32xf32> to vector<8x32xf32>
    %139 = vector.extract_strided_slice %134 {offsets = [2, 0, 0], sizes = [1, 8, 32], strides = [1, 1, 1]} : vector<3x8x32xf32> to vector<1x8x32xf32>
    %140 = vector.shape_cast %139 : vector<1x8x32xf32> to vector<8x32xf32>
    %cst_38 = arith.constant dense<0.000000e+00> : vector<8x32xf32>
    %141 = tpu.matmul %131, %6, %cst_38 {dimension_numbers = #tpu.dot_dimension_numbers<[1], [0], [0], [1], [0, 0, 1, 1], [], []>} : vector<8x32xf32>, vector<32x32xf32>, vector<8x32xf32> -> vector<8x32xf32>
    %142 = vector.broadcast %12 : vector<1x32xf32> to vector<8x32xf32>
    %143 = arith.addf %141, %142 : vector<8x32xf32>
    %cst_39 = arith.constant dense<0.000000e+00> : vector<8x32xf32>
    %144 = tpu.matmul %131, %8, %cst_39 {dimension_numbers = #tpu.dot_dimension_numbers<[1], [0], [0], [1], [0, 0, 1, 1], [], []>} : vector<8x32xf32>, vector<32x32xf32>, vector<8x32xf32> -> vector<8x32xf32>
    %145 = vector.broadcast %14 : vector<1x32xf32> to vector<8x32xf32>
    %146 = arith.addf %144, %145 : vector<8x32xf32>
    %cst_40 = arith.constant dense<0.000000e+00> : vector<8x32xf32>
    %147 = tpu.matmul %131, %10, %cst_40 {dimension_numbers = #tpu.dot_dimension_numbers<[1], [0], [0], [1], [0, 0, 1, 1], [], []>} : vector<8x32xf32>, vector<32x32xf32>, vector<8x32xf32> -> vector<8x32xf32>
    %148 = vector.broadcast %16 : vector<1x32xf32> to vector<8x32xf32>
    %149 = arith.addf %147, %148 : vector<8x32xf32>
    %150 = arith.addf %136, %143 : vector<8x32xf32>
    %151 = arith.negf %150 : vector<8x32xf32>
    %152 = math.exp %151 : vector<8x32xf32>
    %cst_41 = arith.constant 1.000000e+00 : f32
    %153 = vector.broadcast %cst_41 : f32 to vector<8x32xf32>
    %154 = arith.addf %153, %152 : vector<8x32xf32>
    %155 = arith.divf %153, %154 : vector<8x32xf32>
    %156 = arith.addf %138, %146 : vector<8x32xf32>
    %157 = arith.negf %156 : vector<8x32xf32>
    %158 = math.exp %157 : vector<8x32xf32>
    %cst_42 = arith.constant 1.000000e+00 : f32
    %159 = vector.broadcast %cst_42 : f32 to vector<8x32xf32>
    %160 = arith.addf %159, %158 : vector<8x32xf32>
    %161 = arith.divf %159, %160 : vector<8x32xf32>
    %162 = arith.mulf %155, %149 : vector<8x32xf32>
    %163 = arith.addf %140, %162 : vector<8x32xf32>
    %164 = math.tanh %163 : vector<8x32xf32>
    %cst_43 = arith.constant 1.000000e+00 : f32
    %165 = vector.broadcast %cst_43 : f32 to vector<8x32xf32>
    %166 = arith.subf %165, %161 : vector<8x32xf32>
    %167 = arith.mulf %166, %164 : vector<8x32xf32>
    %168 = arith.mulf %161, %131 : vector<8x32xf32>
    %169 = arith.addf %167, %168 : vector<8x32xf32>
    %c4_i32 = arith.constant 4 : i32
    %c0_44 = arith.constant 0 : index
    %c0_45 = arith.constant 0 : index
    %170 = vector.load %arg5[%c0_44, %c0_45] : memref<8x32xf32, #tpu.memory_space<vmem>>, vector<8x32xf32>
    tpu.vector_store %arg5[%c0_44, %c0_45], %169 {strides = array<i32>} : memref<8x32xf32, #tpu.memory_space<vmem>>, vector<8x32xf32>,
    return
  }
  func.func @transform_0(%arg0: i32, %arg1: i32) -> (i32, i32, i32, i32) {
    %c0_i32 = arith.constant 0 : i32
    %c0_i32_0 = arith.constant 0 : i32
    %c0_i32_1 = arith.constant 0 : i32
    return %arg1, %c0_i32, %arg0, %c0_i32_0 : i32, i32, i32, i32
  }
  func.func @transform_1(%arg0: i32, %arg1: i32) -> (i32, i32, i32) {
    %c0_i32 = arith.constant 0 : i32
    %c0_i32_0 = arith.constant 0 : i32
    %c0_i32_1 = arith.constant 0 : i32
    %c0_i32_2 = arith.constant 0 : i32
    return %c0_i32, %c0_i32_0, %c0_i32_1 : i32, i32, i32
  }
  func.func @transform_2(%arg0: i32, %arg1: i32) -> (i32, i32, i32) {
    %c0_i32 = arith.constant 0 : i32
    %c0_i32_0 = arith.constant 0 : i32
    %c0_i32_1 = arith.constant 0 : i32
    %c0_i32_2 = arith.constant 0 : i32
    return %c0_i32, %c0_i32_0, %c0_i32_1 : i32, i32, i32
  }
  func.func @transform_3(%arg0: i32, %arg1: i32) -> (i32, i32) {
    %c0_i32 = arith.constant 0 : i32
    %c0_i32_0 = arith.constant 0 : i32
    return %arg0, %c0_i32 : i32, i32
  }
}

</mosaic_0001>

<bundles_post_ra>
// kernel: tpu_custom_call.1
= control target key start
LH: loop header
LB: loop body
LE: loop exit
PB: predicated region body
PF: predicated region fallthrough
CT: control target
= control target key end

     0   :  { %8 = vsyncpa [#allocation3], 0  ;;  %s2222_s0 = inlined_call_operand.hbm [shape: f32[8,3,8,32], index: 0, kind: input, shape index: {}]   ;;  %s2223_s1 = inlined_call_operand.hbm [shape: f32[3,32,32], index: 1, kind: input, shape index: {}]   ;;  %s2224_s2 = inlined_call_operand.vmem [shape: f32[3,1,32], index: 2, kind: input, shape index: {}]   ;;  %s2225_s3 = inlined_call_operand.hbm [shape: f32[8,32], index: 3, kind: output, shape index: {}]  }
   0x1   :  { %10 = vsyncpa [#allocation3 + $0x1], 0 }
   0x2   :  { %11 = vsyncpa [#allocation6], 0 }
   0x3   :  { %12 = vsyncpa [#allocation4], 0  ;;  %s1894_s12 = smov 0   ;;  %s1896_s13 = smov 0  }
   0x4   :  { %s1898_s14 = smov 0   ;;  %s1900_s15 = smov 0  }
   0x5   :  { %s1902_s16 = smov 0   ;;  %s1904_s17 = smov 0  }
   0x6 LB: > { %s1289_s18 = sadd.s32 4294967295, %s1863_s17   ;;  %p52_p0 = scmp.ne.s32.totalorder %s1847_s13, %s1843_s12  ;;  %s1863_s17 = sphi %s1904_s17, %s18_s17   ;;  %s1859_s16 = sphi %s1902_s16, %s2243_s16   ;;  %s1855_s15 = sphi %s1900_s15, %s2242_s15   ;;  %s1851_s14 = sphi %s1898_s14, %s2241_s14   ;;  %s1847_s13 = sphi %s1896_s13, %s2240_s13   ;;  %s1843_s12 = sphi %s1894_s12, %s2239_s12  }
   0x7   : > { %p1926_p1 = scmp.eq.s32.totalorder %s1289_s18, 0  ;;  %p1290_p2 = scmp.ge.s32.totalorder %s1863_s17, 1 }
   0x8   : > { %p131_p3 = scmp.lt.s32.totalorder %s1863_s17, 3  ;;  %s1865_s22 = smov [#allocation5]  }
   0x9   : > { %s2230_s19 = scalar_select %p1926_p1, 1, 0 }
   0xa   : > { %p1934_p4 = por %p1926_p1, %p52_p0  ;;  %p1938_p5 = pnand %p1290_p2, %p131_p3 }
   0xb   : > { %s143_s23 = sshll.u32 %s1865_s22, 4  ;;  %s27_s25 = sadd.s32 1, %s1859_s16  ;;  %s144_s23 = int_to_ptr.vmem [resolvable:$true] %s143_s23 }
   0xc   : > { %s2231_s20 = scalar_select %p1934_p4, 1, 0 }
   0xd   : > { %s2232_s21 = scalar_select %p1938_p5, 1, 0 }
   0xe   : > { %p1612_p6 = pneg %p1938_p5  ;;  %s1721_s28 = scalar_lea.hbm %s2223_s1, 1536 }
   0xf   : > { %p1722_p8 = scmp.ne.s32.totalorder %s2223_s1, %s1721_s28  ;;  %p1728_p12 = scmp.lt.u32.totalorder %s1721_s28, %s2223_s1 }
  0x10   : > { %p1946_p7 = pnand %p1612_p6, %p1926_p1 }
  0x12   : > { %p1723_p9 = pneg %p1946_p7 }
  0x14   : > { %p1724_p10 = pnand %p1723_p9, %p1722_p8 }
  0x16   : > { %p1725_p11 = pneg %p1724_p10 }
  0x18   : > { %p1730_p13 = pnand %p1728_p12, %p1725_p11 }
  0x1a   : > { %1733 = shalt.err (!%p1730_p13)
}
  0x1b   : > { %s1734_s6 = scalar_lea.vmem %s144_s23, 1536  ;;  %p1742_p6 = scmp.lt.s32.totalorder %s144_s23, %s144_s23 }
  0x1c   : > { %p1735_p0 = scmp.ne.s32.totalorder %s144_s23, %s1734_s6  ;;  %p1743_p1 = scmp.lt.s32.totalorder %s1734_s6, %s1734_s6 }
  0x1e   : > { %p1737_p2 = pnand %p1735_p0, %p1723_p9  ;;  %p1744_p4 = por %p1743_p1, %p1742_p6 }
  0x20   : > { %p1738_p3 = pneg %p1737_p2 }
  0x22   : > { %p1745_p5 = pnand %p1744_p4, %p1738_p3 }
  0x24   : > { %1748 = shalt.err (!%p1745_p5)
}
  0x25   : > { %s1866_s7 = smov 128   ;;  %s1867_s8 = smov 8  }
  0x26   : > { %1615 = dma.hbm_to_vmem [thread:$0]  (!%p1946_p7), %s2223_s1, 1536, %s144_s23, [#allocation6], %s1866_s7, %s1866_s7, %s1867_s8  }
  0x27   : > { %p28_p1 = scmp.ge.s32.totalorder %s27_s25, 2  ;;  %s39_s11 = sadd.s32 1, %s1851_s14 }
  0x28   : > { %p46_p4 = scmp.ne.s32.totalorder %s1851_s14, %s1847_s13  ;;  %p47_p5 = scmp.eq.s32.totalorder %s1863_s17, 0 }
  0x29   : > { %s2245_s25 = smov (%p28_p1, %s27_s25), 0  ;;  %p1621_p9 = scmp.lt.s32.totalorder %s1863_s17, 2 }
  0x2a   : > { %p48_p8 = por %p47_p5, %p46_p4  ;;  %s34_s12 = ssub.s32 %s1859_s16, %s2245_s25 }
  0x2b   : > { %s160_s22 = sand.u32 1, %s1851_s14   ;;  %p37_p10 = scmp.eq.s32.totalorder %s34_s12, 0 }
  0x2c   : > { %s1599_s24 = smul.u32 96, %s160_s22  ;;  %p1980_p11 = pnand %p1621_p9, %p48_p8 }
  0x2d   : > { %s1985_s23 = scalar_select %p37_p10, %s1851_s14, %s39_s11  }
  0x2e   : > { %s1600_s27 = smul.u32 1536, %s1859_s16  ;;  %s164_s28 = scalar_lea.vmem [#allocation2], %s1599_s24 }
  0x2f   : > { %s173_s29 = sshll.u32 %s164_s28, 4  ;;  %s1995_s6 = scalar_lea.sflag [#allocation3], %s160_s22  ;;  %s1993_s29 = int_to_ptr.vmem [resolvable:$true] %s173_s29 }
  0x30   : > { %s1991_s5 = scalar_lea.hbm %s2222_s0, %s1600_s27  ;;  %p1751_p12 = pneg %p1980_p11 }
  0x31   : > { %s1749_s9 = scalar_lea.hbm %s1991_s5, 1536  ;;  %s1754_s12 = scalar_lea.hbm %s2222_s0, 3072 }
  0x32   : > { %p1750_p7 = scmp.ne.s32.totalorder %s1991_s5, %s1749_s9  ;;  %p1755_p2 = scmp.lt.u32.totalorder %s1991_s5, %s2222_s0 }
  0x33   : > { %p1756_p3 = scmp.lt.u32.totalorder %s1754_s12, %s1749_s9  ;;  %p1758_p1 = scmp.lt.u32.totalorder %s1749_s9, %s1991_s5 }
  0x34   : > { %p1752_p13 = pnand %p1751_p12, %p1750_p7 }
  0x35   : > { %p1757_p6 = por %p1756_p3, %p1755_p2 }
  0x36   : > { %p1753_p0 = pneg %p1752_p13 }
  0x37   : > { %p1759_p4 = por %p1758_p1, %p1757_p6 }
  0x39   : > { %p1760_p5 = pnand %p1759_p4, %p1753_p0 }
  0x3b   : > { %1763 = shalt.err (!%p1760_p5)
}
  0x3c   : > { %s1764_s22 = scalar_lea.vmem %s1993_s29, 1536  ;;  %s1868_s28 = smov [#allocation2]  }
  0x3d   : > { %p1765_p8 = scmp.ne.s32.totalorder %s1993_s29, %s1764_s22  ;;  %s1769_s30 = sshll.u32 %s1868_s28, 4  ;;  %s1770_s30 = int_to_ptr.vmem [resolvable:$false] %s1769_s30 }
  0x3e   : > { %s1771_s4 = scalar_lea.vmem %s1770_s30, 3072  ;;  %p1772_p7 = scmp.lt.s32.totalorder %s1993_s29, %s1770_s30 }
  0x3f   : > { %p1767_p9 = pnand %p1765_p8, %p1751_p12  ;;  %p1773_p13 = scmp.lt.s32.totalorder %s1771_s4, %s1764_s22 }
  0x41   : > { %p1768_p10 = pneg %p1767_p9  ;;  %p1774_p2 = por %p1773_p13, %p1772_p7 }
  0x43   : > { %p1775_p3 = pnand %p1774_p2, %p1768_p10 }
  0x45   : > { %1778 = shalt.err (!%p1775_p3)
}
  0x46   : > { %1619 = dma.hbm_to_vmem [thread:$0]  (!%p1980_p11), %s1991_s5, 1536, %s1993_s29, %s1995_s6, %s1866_s7, %s1866_s7, %s1867_s8  }
  0x47   : > { %p2235_p12 = scmp.ne.s32.totalorder %s2232_s21, 0 }
  0x48   : > { %s187_s9 = sand.u32 (!%p2235_p12), 1, %s1847_s13   ;;  %p2236_p0 = scmp.ne.s32.totalorder (!%p2235_p12), %s2231_s20, 0 }
  0x49   : > { %185 = sbr.rel (%p2235_p12) target bundleno = 1162 (0x48a), region = 32  ;;  %s188_s11 = scalar_lea.sflag (!%p2235_p12), [#allocation3], %s187_s9 }
  0x4a   : > { %s1601_s10 = smul.u32 (!%p2235_p12), 96, %s187_s9 }
  0x4c   : > { %s2029_s12 = scalar_lea.vmem (!%p2235_p12), [#allocation2], %s1601_s10 }
  0x50   : > { %1830 = dma.done.wait (%p2236_p0), %s188_s11, 1536  }
  0x51   : > { %1832 = vsyncadd (%p2236_p0), %s188_s11, 4294965760  ;;  %p2237_p6 = scmp.ne.s32.totalorder %s2230_s19, 0 }
  0x53   : > { %1834 = dma.done.wait (%p2237_p6), [#allocation6], 1536  }
  0x54   : > { %1836 = vsyncadd (%p2237_p6), [#allocation6], 4294965760  ;;  %p1298_p11 = scmp.ne.s32.totalorder %s1855_s15, 0 }
  0x55   : > { %vm218_vm0 = vcmask (!%p1298_p11), 261120   ;;  %v1869_v0 = vmov (!%p1298_p11), 0.0  }
  0x56   : > { %217 = sbr.rel (%p1298_p11) target bundleno = 93 (0x5d), region = 44  ;;  %219 = vst.msk [vmem:[#allocation7] sm:$0xff] (!%p1298_p11), %vm218_vm0, %v1869_v0 }
  0x5d PF: > { %v220_v1 = vld [vmem:[#allocation5] sm:$0xff]  ;;  %v221_v2 = vld [vmem:[#allocation5 + $0x8] sm:$0xff]  ;;  %v222_v3 = vld [vmem:[#allocation5 + $0x10] sm:$0xff]  ;;  %v1870_v4 = vmov 0.0|0.0   ;;  %vm1871_vm1 = vmmov 0   ;;  %v1872_v7 = vmov 0.0  }
  0x5e   : > { %1527 = vmatprep.subr.bf16.mxu0 %v1870_v4  ;;  %v2041_v5 = vpack.c.bf16 %v221_v2, %v220_v1  ;;  %v223_v6 = vld [vmem:[#allocation5 + $0x18] sm:$0xff]  ;;  %1403 = vmatprep.mubr.msk.f32.mxu0 %vm1871_vm1, %v1872_v7  ;;  %v224_v8 = vld [vmem:[#allocation5 + $0x20] sm:$0xff]  ;;  %v225_v9 = vld [vmem:[#allocation5 + $0x28] sm:$0xff]  ;;  %vm245_vm2 = vcmask 261120   ;;  %s1873_s26 = smov [#allocation7]   ;;  %p2177_p1 = scmp.eq.s32.totalorder %s1289_s18, 1 }
  0x5f   : > { %1533 = vmatprep.subr.bf16.mxu1 %v1870_v4  ;;  %v226_v10 = vld [vmem:[#allocation5 + $0x30] sm:$0xff]  ;;  %v227_v11 = vld [vmem:[#allocation5 + $0x38] sm:$0xff]  ;;  %1414 = vmatprep.mubr.msk.f32.mxu1 %vm1871_vm1, %v1872_v7  ;;  %v2049_v12 = vpack.c.bf16 %v223_v6, %v222_v3  ;;  %v2051_v13 = vpack.c.bf16 %v225_v9, %v224_v8  ;;  %v228_v14 = vld [vmem:[#allocation5 + $0x40] sm:$0xff]  ;;  %s1216_s29 = sshll.u32 %s1873_s26, 4  ;;  %s1217_s29 = int_to_ptr.vmem [resolvable:$true] %s1216_s29 }
  0x60   : > { %1529 = vmatpush3.bf16.msra.mxu0 %v2041_v5  ;;  %v229_v15 = vld [vmem:[#allocation5 + $0x48] sm:$0xff]  ;;  %v2055_v16 = vpack.c.bf16 %v227_v11, %v226_v10  ;;  %v235_v17 = vld [vmem:[#allocation7] sm:$0xff]  ;;  %v230_v19 = vld [vmem:[#allocation5 + $0x50] sm:$0xff]  ;;  %s1779_s6 = scalar_lea.vmem %s1217_s29, 128  ;;  %p1786_p9 = scmp.lt.s32.totalorder %s1217_s29, %s1217_s29 }
  0x61   : > { %1530 = vmatprep.subr.bf16.mxu0 %v1870_v4  ;;  %1535 = vmatpush3.bf16.msra.mxu1 %v2051_v13  ;;  %v2059_v18 = vpack.c.bf16 %v229_v15, %v228_v14  ;;  %v231_v20 = vld [vmem:[#allocation5 + $0x58] sm:$0xff]  ;;  %v2090_v22 = vld [vmem:[%s2224_s2] ss:$0 sm:$0xff]  ;;  %v2096_v25 = vld [vmem:[%s2224_s2 + $0x1] ss:$0 sm:$0xff]  ;;  %p1780_p4 = scmp.ne.s32.totalorder %s1217_s29, %s1779_s6  ;;  %p1787_p10 = scmp.lt.s32.totalorder %s1779_s6, %s1779_s6 }
  0x62   : > { %1536 = vmatprep.subr.bf16.mxu1 %v1870_v4  ;;  %v2066_v21 = vpack.c.bf16 %v231_v20, %v230_v19  ;;  %v236_v23 = vld [vmem:[%s2029_s12] sm:$0xff]  ;;  %v237_v28 = vld [vmem:[%s2029_s12 + $0x8] sm:$0xff]  ;;  %v238_v45 = vld [vmem:[%s2029_s12 + $0x10] sm:$0xff] }
  0x63   : > { %v2104_v41 = vld [vmem:[%s2224_s2 + $0x2] ss:$0 sm:$0xff]  ;;  %v1307_v54 = vld [vmem:[%s2029_s12 + $0x18] sm:$0xff]  ;;  %v1309_v15 = vld [vmem:[%s2029_s12 + $0x28] sm:$0xff]  ;;  %p1781_p5 = pnand %p1780_p4, %p2177_p1  ;;  %p1788_p7 = por %p1787_p10, %p1786_p9 }
  0x64   : > { %1532 = vmatpush3.bf16.msra.mxu0 %v2049_v12  ;;  %v1308_v62 = vld [vmem:[%s2029_s12 + $0x20] sm:$0xff] }
  0x65   : > { %1539 = vmatprep.subr.bf16.mxu0 %v1870_v4  ;;  %1538 = vmatpush3.bf16.msra.mxu1 %v2055_v16  ;;  %p1782_p8 = pneg %p1781_p5 }
  0x66   : > { %1545 = vmatprep.subr.bf16.mxu1 %v1870_v4 }
  0x67   : > { %1404 = vmatmul.mubr.msk.f32.vlgmr.msra.gmra.mrb[0].mxu0 %vm245_vm2, %v235_v17  ;;  %p1789_p13 = pnand %p1788_p7, %p1782_p8 }
  0x68   : > { %1541 = vmatpush3.bf16.msra.mxu0 %v2059_v18  ;;  %1425 = vmatprep.mubr.msk.f32.mxu0 %vm1871_vm1, %v1872_v7 }
  0x69   : > { %1415 = vmatmul.mubr.msk.f32.vlgmr.msra.gmra.mrb[0].mxu1 %vm245_vm2, %v235_v17  ;;  %1542 = vmatprep.subr.bf16.mxu0 %v1870_v4 }
  0x6a   : > { %1547 = vmatpush3.bf16.msra.mxu1 %v2041_v5  ;;  %1436 = vmatprep.mubr.msk.f32.mxu1 %vm1871_vm1, %v1872_v7 }
  0x6b   : > { %1548 = vmatprep.subr.bf16.mxu1 %v1870_v4 }
  0x6c   : > { %1544 = vmatpush3.bf16.msra.mxu0 %v2066_v21 }
  0x6d   : > { %1551 = vmatprep.subr.bf16.mxu0 %v1870_v4 }
  0x6e   : > { %1550 = vmatpush3.bf16.msra.mxu1 %v2049_v12 }
  0x6f   : > { %1426 = vmatmul.mubr.msk.f32.vlgmr.msra.gmra.mrb[2].mxu0 %vm245_vm2, %v235_v17  ;;  %1557 = vmatprep.subr.bf16.mxu1 %v1870_v4 }
  0x70   : > { %1553 = vmatpush3.bf16.msra.mxu0 %v2051_v13  ;;  %1447 = vmatprep.mubr.msk.f32.mxu0 %vm1871_vm1, %v1872_v7 }
  0x71   : > { %1554 = vmatprep.subr.bf16.mxu0 %v1870_v4 }
  0x74   : > { %1556 = vmatpush3.bf16.msra.mxu0 %v2055_v16 }
  0x75   : > { %1563 = vmatprep.subr.bf16.mxu0 %v1870_v4 }
 0x13a   : > { %v315_v24 = vpop.f32.mrb[0].mxu0 }
 0x13b   : > { %v316_v26 = vadd.f32 %v2090_v22, %v315_v24  ;;  %v1405_v27 = vpop.f32.mrb[1].mxu0 }
 0x13c   : > { %v391_v29 = vpop.f32.mrb[0].mxu1 }
 0x13d   : > { %v471_v30 = vadd.f32 %v316_v26, %v236_v23  ;;  %v392_v31 = vadd.f32 %v2096_v25, %v391_v29  ;;  %v1416_v32 = vpop.f32.mrb[1].mxu1 }
 0x13f   : > { %v1305_v33 = vmul.f32 -1.442695, %v471_v30  ;;  %v478_v34 = vadd.f32 %v392_v31, %v237_v28 }
 0x141   : > { %1681 = vpow2.f32 %v1305_v33  ;;  %v1306_v35 = vmul.f32 -1.442695, %v478_v34 }
 0x142   : > { %v467_v36 = vpop.f32.mrb[2].mxu0 }
 0x143   : > { %v1427_v37 = vpop.f32.mrb[3].mxu0  ;;  %1683 = vpow2.f32 %v1306_v35  ;;  %v468_v43 = vadd.f32 %v2104_v41, %v467_v36  ;;  %v1316_v35 = vld [vmem:[%s2029_s12 + $0x38] sm:$0xff] }
 0x14b   : > { %v1682_v38 = vpop.eup %1681 }
 0x14c   : > { %v475_v39 = vadd.f32 1.0, %v1682_v38 }
 0x14d   : > { %v1684_v40 = vpop.eup %1683 }
 0x14e   : > { %1685 = vrcp.f32 %v475_v39  ;;  %v482_v42 = vadd.f32 1.0, %v1684_v40 }
 0x150   : > { %1687 = vrcp.f32 %v482_v42 }
 0x158   : > { %v1686_v44 = vpop.eup %1685 }
 0x159   : > { %v485_v46 = vmul.f32 %v1686_v44, %v468_v43 }
 0x15a   : > { %v1688_v48 = vpop.eup %1687 }
 0x15b   : > { %v486_v47 = vadd.f32 %v485_v46, %v238_v45  ;;  %v488_v49 = vsub.f32 1.0, %v1688_v48  ;;  %v490_v52 = vmul.f32 %v1688_v48, %v235_v17  ;;  %v1317_v46 = vld [vmem:[%s2029_s12 + $0x40] sm:$0xff] }
 0x15d   : > { %1689 = vtanh.f32 %v486_v47 }
 0x167   : > { %v1690_v50 = vpop.eup %1689 }
 0x168   : > { %v489_v51 = vmul.f32 %v1690_v50, %v488_v49 }
 0x16a   : > { %v491_v53 = vadd.f32 %v490_v52, %v489_v51 }
 0x16c   : > { %1437 = vmatmul.mubr.msk.f32.vlgmr.msra.gmra.mrb[2].mxu1 %vm245_vm2, %v491_v53  ;;  %1448 = vmatmul.mubr.msk.f32.vlgmr.msra.gmra.mrb[4].mxu0 %vm245_vm2, %v491_v53 }
 0x16d   : > { %1559 = vmatpush3.bf16.msra.mxu1 %v2059_v18  ;;  %1458 = vmatprep.mubr.msk.f32.mxu1 %vm1871_vm1, %v1872_v7 }
 0x16e   : > { %1560 = vmatprep.subr.bf16.mxu1 %v1870_v4  ;;  %1565 = vmatpush3.bf16.msra.mxu0 %v2041_v5 }
 0x16f   : > { %1566 = vmatprep.subr.bf16.mxu0 %v1870_v4  ;;  %1469 = vmatprep.mubr.msk.f32.mxu0 %vm1871_vm1, %v1872_v7 }
 0x171   : > { %1562 = vmatpush3.bf16.msra.mxu1 %v2066_v21 }
 0x172   : > { %1569 = vmatprep.subr.bf16.mxu1 %v1870_v4  ;;  %1568 = vmatpush3.bf16.msra.mxu0 %v2049_v12 }
 0x173   : > { %1575 = vmatprep.subr.bf16.mxu0 %v1870_v4 }
 0x174   : > { %1459 = vmatmul.mubr.msk.f32.vlgmr.msra.gmra.mrb[4].mxu1 %vm245_vm2, %v491_v53 }
 0x175   : > { %1571 = vmatpush3.bf16.msra.mxu1 %v2051_v13  ;;  %1480 = vmatprep.mubr.msk.f32.mxu1 %vm1871_vm1, %v1872_v7 }
 0x176   : > { %1572 = vmatprep.subr.bf16.mxu1 %v1870_v4 }
 0x179   : > { %1574 = vmatpush3.bf16.msra.mxu1 %v2055_v16 }
 0x17a   : > { %1581 = vmatprep.subr.bf16.mxu1 %v1870_v4 }
 0x23f   : > { %v565_v55 = vpop.f32.mrb[2].mxu1  ;;  %v635_v56 = vpop.f32.mrb[4].mxu0 }
 0x240   : > { %v566_v57 = vadd.f32 %v2090_v22, %v565_v55  ;;  %v1438_v58 = vpop.f32.mrb[3].mxu1  ;;  %v1449_v59 = vpop.f32.mrb[5].mxu0  ;;  %v636_v60 = vadd.f32 %v2096_v25, %v635_v56  ;;  %v1323_v55 = vld [vmem:[%s2029_s12 + $0x48] sm:$0xff] }
 0x242   : > { %v709_v61 = vadd.f32 %v1307_v54, %v566_v57  ;;  %v716_v0 = vadd.f32 %v1308_v62, %v636_v60 }
 0x244   : > { %v1313_v63 = vmul.f32 -1.442695, %v709_v61  ;;  %v1314_v3 = vmul.f32 -1.442695, %v716_v0 }
 0x246   : > { %1691 = vpow2.f32 %v1313_v63 }
 0x247   : > { %v705_v1 = vpop.f32.mrb[4].mxu1  ;;  %1693 = vpow2.f32 %v1314_v3 }
 0x248   : > { %v1460_v2 = vpop.f32.mrb[5].mxu1  ;;  %v706_v11 = vadd.f32 %v2104_v41, %v705_v1 }
 0x250   : > { %v1692_v6 = vpop.eup %1691 }
 0x251   : > { %v713_v8 = vadd.f32 1.0, %v1692_v6  ;;  %v1694_v9 = vpop.eup %1693 }
 0x252   : > { %v720_v10 = vadd.f32 1.0, %v1694_v9 }
 0x253   : > { %1695 = vrcp.f32 %v713_v8 }
 0x254   : > { %1697 = vrcp.f32 %v720_v10 }
 0x25d   : > { %v1696_v14 = vpop.eup %1695 }
 0x25e   : > { %v723_v17 = vmul.f32 %v1696_v14, %v706_v11  ;;  %v1698_v20 = vpop.eup %1697 }
 0x25f   : > { %v726_v23 = vsub.f32 1.0, %v1698_v20  ;;  %v728_v27 = vmul.f32 %v1698_v20, %v491_v53 }
 0x260   : > { %v724_v19 = vadd.f32 %v1309_v15, %v723_v17 }
 0x262   : > { %1699 = vtanh.f32 %v724_v19 }
 0x26c   : > { %v1700_v24 = vpop.eup %1699 }
 0x26d   : > { %v727_v26 = vmul.f32 %v1700_v24, %v726_v23 }
 0x26f   : > { %v729_v28 = vadd.f32 %v728_v27, %v727_v26 }
 0x271   : > { %1470 = vmatmul.mubr.msk.f32.vlgmr.msra.gmra.mrb[6].mxu0 %vm245_vm2, %v729_v28  ;;  %1481 = vmatmul.mubr.msk.f32.vlgmr.msra.gmra.mrb[6].mxu1 %vm245_vm2, %v729_v28 }
 0x272   : > { %1577 = vmatpush3.bf16.msra.mxu0 %v2059_v18  ;;  %1491 = vmatprep.mubr.msk.f32.mxu0 %vm1871_vm1, %v1872_v7 }
 0x273   : > { %1578 = vmatprep.subr.bf16.mxu0 %v1870_v4  ;;  %1583 = vmatpush3.bf16.msra.mxu1 %v2041_v5  ;;  %v1315_v5 = vld [vmem:[%s2029_s12 + $0x30] sm:$0xff] }
 0x274   : > { %1584 = vmatprep.subr.bf16.mxu1 %v1870_v4  ;;  %1502 = vmatprep.mubr.msk.f32.mxu1 %vm1871_vm1, %v1872_v7 }
 0x276   : > { %1580 = vmatpush3.bf16.msra.mxu0 %v2066_v21 }
 0x277   : > { %1587 = vmatprep.subr.bf16.mxu0 %v1870_v4  ;;  %1586 = vmatpush3.bf16.msra.mxu1 %v2049_v12 }
 0x278   : > { %1593 = vmatprep.subr.bf16.mxu1 %v1870_v4 }
 0x279   : > { %1492 = vmatmul.mubr.msk.f32.vlgmr.msra.gmra.mrb[8].mxu0 %vm245_vm2, %v729_v28 }
 0x27a   : > { %1589 = vmatpush3.bf16.msra.mxu0 %v2051_v13  ;;  %1513 = vmatprep.mubr.msk.f32.mxu0 %vm1871_vm1, %v1872_v7 }
 0x27b   : > { %1590 = vmatprep.subr.bf16.mxu0 %v1870_v4 }
 0x27e   : > { %1592 = vmatpush3.bf16.msra.mxu0 %v2055_v16 }
 0x344   : > { %v803_v29 = vpop.f32.mrb[6].mxu0  ;;  %v873_v30 = vpop.f32.mrb[6].mxu1 }
 0x345   : > { %v804_v31 = vadd.f32 %v2090_v22, %v803_v29  ;;  %v1471_v32 = vpop.f32.mrb[7].mxu0  ;;  %v1482_v12 = vpop.f32.mrb[7].mxu1  ;;  %v874_v33 = vadd.f32 %v2096_v25, %v873_v30 }
 0x347   : > { %v947_v34 = vadd.f32 %v1315_v5, %v804_v31  ;;  %v954_v36 = vadd.f32 %v1316_v35, %v874_v33 }
 0x349   : > { %v1321_v13 = vmul.f32 -1.442695, %v947_v34  ;;  %v1322_v39 = vmul.f32 -1.442695, %v954_v36 }
 0x34b   : > { %1701 = vpow2.f32 %v1321_v13 }
 0x34c   : > { %v943_v37 = vpop.f32.mrb[8].mxu0  ;;  %1703 = vpow2.f32 %v1322_v39 }
 0x34d   : > { %v1493_v38 = vpop.f32.mrb[9].mxu0  ;;  %v944_v44 = vadd.f32 %v2104_v41, %v943_v37 }
 0x355   : > { %v1702_v16 = vpop.eup %1701 }
 0x356   : > { %v951_v40 = vadd.f32 1.0, %v1702_v16  ;;  %v1704_v42 = vpop.eup %1703 }
 0x357   : > { %v958_v43 = vadd.f32 1.0, %v1704_v42 }
 0x358   : > { %1705 = vrcp.f32 %v951_v40 }
 0x359   : > { %1707 = vrcp.f32 %v958_v43 }
 0x362   : > { %v1706_v45 = vpop.eup %1705 }
 0x363   : > { %v961_v47 = vmul.f32 %v1706_v45, %v944_v44  ;;  %v1708_v49 = vpop.eup %1707 }
 0x364   : > { %v964_v50 = vsub.f32 1.0, %v1708_v49  ;;  %v966_v53 = vmul.f32 %v1708_v49, %v729_v28 }
 0x365   : > { %v962_v48 = vadd.f32 %v1317_v46, %v961_v47 }
 0x367   : > { %1709 = vtanh.f32 %v962_v48 }
 0x371   : > { %v1710_v51 = vpop.eup %1709 }
 0x372   : > { %v965_v52 = vmul.f32 %v1710_v51, %v964_v50 }
 0x374   : > { %v967_v54 = vadd.f32 %v966_v53, %v965_v52 }
 0x376   : > { %1503 = vmatmul.mubr.msk.f32.vlgmr.msra.gmra.mrb[8].mxu1 %vm245_vm2, %v967_v54  ;;  %1514 = vmatmul.mubr.msk.f32.vlgmr.msra.gmra.mrb[10].mxu0 %vm245_vm2, %v967_v54 }
 0x377   : > { %1595 = vmatpush3.bf16.msra.mxu1 %v2059_v18  ;;  %1524 = vmatprep.mubr.msk.f32.mxu1 %vm1871_vm1, %v1872_v7  ;;  %v1324_v18 = vld [vmem:[%s2029_s12 + $0x50] sm:$0xff] }
 0x378   : > { %1596 = vmatprep.subr.bf16.mxu1 %v1870_v4 }
 0x37b   : > { %1598 = vmatpush3.bf16.msra.mxu1 %v2066_v21 }
 0x37e   : > { %1525 = vmatmul.mubr.msk.f32.vlgmr.msra.gmra.mrb[10].mxu1 %vm245_vm2, %v967_v54 }
 0x449   : > { %v1041_v56 = vpop.f32.mrb[8].mxu1  ;;  %v1111_v57 = vpop.f32.mrb[10].mxu0 }
 0x44a   : > { %v1042_v58 = vadd.f32 %v2090_v22, %v1041_v56  ;;  %v1504_v59 = vpop.f32.mrb[9].mxu1  ;;  %v1515_v60 = vpop.f32.mrb[11].mxu0  ;;  %v1112_v61 = vadd.f32 %v2096_v25, %v1111_v57  ;;  %v1325_v25 = vld [vmem:[%s2029_s12 + $0x58] sm:$0xff] }
 0x44c   : > { %v1185_v62 = vadd.f32 %v1323_v55, %v1042_v58  ;;  %v1192_v7 = vadd.f32 %v1324_v18, %v1112_v61 }
 0x44e   : > { %v1329_v63 = vmul.f32 -1.442695, %v1185_v62  ;;  %v1330_v21 = vmul.f32 -1.442695, %v1192_v7 }
 0x450   : > { %1711 = vpow2.f32 %v1329_v63 }
 0x451   : > { %v1181_v4 = vpop.f32.mrb[10].mxu1  ;;  %1713 = vpow2.f32 %v1330_v21 }
 0x452   : > { %v1526_v0 = vpop.f32.mrb[11].mxu1  ;;  %v1182_v6 = vadd.f32 %v2104_v41, %v1181_v4 }
 0x45a   : > { %v1712_v1 = vpop.eup %1711 }
 0x45b   : > { %v1189_v2 = vadd.f32 1.0, %v1712_v1  ;;  %v1714_v3 = vpop.eup %1713 }
 0x45c   : > { %v1196_v22 = vadd.f32 1.0, %v1714_v3 }
 0x45d   : > { %1715 = vrcp.f32 %v1189_v2 }
 0x45e   : > { %1717 = vrcp.f32 %v1196_v22 }
 0x467   : > { %v1716_v8 = vpop.eup %1715 }
 0x468   : > { %v1199_v9 = vmul.f32 %v1716_v8, %v1182_v6  ;;  %v1718_v11 = vpop.eup %1717 }
 0x469   : > { %v1202_v14 = vsub.f32 1.0, %v1718_v11  ;;  %v1204_v19 = vmul.f32 %v1718_v11, %v967_v54 }
 0x46a   : > { %v1200_v10 = vadd.f32 %v1325_v25, %v1199_v9 }
 0x46c   : > { %1719 = vtanh.f32 %v1200_v10 }
 0x476   : > { %v1720_v15 = vpop.eup %1719 }
 0x477   : > { %v1203_v17 = vmul.f32 %v1720_v15, %v1202_v14 }
 0x479   : > { %v1205_v41 = vadd.f32 %v1204_v19, %v1203_v17 }
 0x47b   : > { %1206 = vst.msk [vmem:[#allocation7] sm:$0xff] %vm245_vm2, %v1205_v41 }
 0x47c   : > { %1792 = shalt.err (!%p1789_p13)
}
 0x47d   : > { %s1793_s27 = scalar_lea.hbm %s2225_s3, 128 }
 0x47e   : > { %p1794_p2 = scmp.ne.s32.totalorder %s2225_s3, %s1793_s27  ;;  %p1799_p0 = scmp.lt.u32.totalorder %s1793_s27, %s2225_s3 }
 0x480   : > { %p1795_p3 = pnand %p1794_p2, %p2177_p1 }
 0x482   : > { %p1796_p12 = pneg %p1795_p3 }
 0x484   : > { %p1801_p6 = pnand %p1799_p0, %p1796_p12 }
 0x486   : > { %1804 = shalt.err (!%p1801_p6)
}
 0x487   : > { %1609 = dma.vmem_to_hbm [thread:$0]  (%p2177_p1), %s1217_s29, 128, %s2225_s3, [#allocation4]  }
 0x488   : > { %1838 = dma.done.wait (%p2177_p1), [#allocation4], 128  }
 0x489   : > { %1840 = vsyncadd (%p2177_p1), [#allocation4], 4294967168 }
 0x48a PF: > { %s18_s17 = sadd.s32 1, %s1863_s17   ;;  %s2239_s12 = smov %s1847_s13 }
 0x48b   : > { %p15_p11 = scmp.ge.s32.totalorder %s18_s17, 4   ;;  %s2240_s13 = smov %s1851_s14 }
 0x48c   : > { %s2241_s14 = smov %s1985_s23  ;;  %s2242_s15 = smov %s1859_s16 }
 0x48d   : > { %s2243_s16 = smov %s2245_s25  ;;  %17 = sbr.rel (!%p15_p11) target bundleno = 6 (0x6), region = 81 }
 0x494   :  { %1229 = vsyncpa [#allocation3], 1 }
 0x495   :  { %1231 = vsyncpa [#allocation3 + $0x1], 1 }
 0x496   :  { %1232 = vsyncpa [#allocation6], 1 }
 0x497   :  { %1233 = vsyncpa [#allocation4], 1 }
 0x498   :  { %1235 = vsyncpa [#allocation4 + $0x1], 1 }

</bundles_post_ra>
